<compile_context>
chip_gen: v7x
topology: tpu7x:2x2x1
jax: 0.10.0
libtpu: 0.0.40
codegen_flags: <defaults>
</compile_context>

<pallas_src>
import jax
import jax.numpy as jnp
from jax.experimental import pallas as pl
from jax.experimental.pallas import tpu as pltpu

IN_FEATURES = 3
OUT_FEATURES = 8
GROUP = 16                          # batch rows packed per lane-dense row
PACKED_IN = GROUP * IN_FEATURES     # 48
LANES = GROUP * OUT_FEATURES        # 128

_ROW_TILE_CANDIDATES = (512, 256, 128, 64, 32, 16, 8)
_MIN_STEPS = 8


def _round_up(n, m):
    return ((n + m - 1) // m) * m


def _pick_row_tile(R):
    # R = number of packed rows (16 batch rows each); wrapper guarantees R >= 8.
    # Largest tile that still yields >= _MIN_STEPS grid steps (DMA/compute
    # overlap + both v7x TCs); small problems fall back to 8-row blocks with a
    # cdiv grid.  Partial tail blocks are safe: math is row-local and
    # out-of-range output rows are dropped on store.
    for tr in _ROW_TILE_CANDIDATES:
        if R >= _MIN_STEPS * tr:
            return tr
    return 8


def _linear_add_relu_kernel(xp_ref, a_ref, b_ref, other_ref, o_ref):
    # xp_ref:    (TR, 48)   xp[r, i*3+k]  = x1[16r+i, k]        (zero-copy pack)
    # a_ref:     (48, 128)  A[i*3+k, i*8+o] = W[o, k]           (kron(I16, W^T))
    # b_ref:     (1, 128)   b[0, i*8+o]   = bias[o]
    # other_ref: (TR, 128)  op[r, i*8+o]  = other[16r+i, o]
    # o_ref:     (TR, 128)  out[r, i*8+o] = result[16r+i, o]
    y = jnp.dot(xp_ref[...], a_ref[...], preferred_element_type=jnp.float32)
    y = y + b_ref[...] + other_ref[...]
    o_ref[...] = jnp.maximum(y, 0.0).astype(o_ref.dtype)


def pack_params(weight, bias):
    """One-time parameter packing (setup time, not in the hot path)."""
    # Block-diagonal expansion: A[i*3+k, i*8+o] = W[o, k], zero elsewhere.
    a_packed = jnp.kron(jnp.eye(GROUP, dtype=weight.dtype), weight.T)  # (48, 128)
    bias_packed = jnp.tile(bias, GROUP).reshape(1, LANES)              # (1, 128)
    return a_packed, bias_packed


@jax.jit
def linear_add_relu(x1, other, a_packed, bias_packed):
    """x1: (B, 3); other: (B, 8); params pre-packed by pack_params."""
    B = x1.shape[0]

    # Fast path needs B % 16 == 0 and at least 8 packed rows; otherwise pad
    # (one wrapper copy) and slice the result back.
    Bp = _round_up(B, GROUP)
    if Bp // GROUP < _MIN_STEPS:
        Bp = _round_up(B, GROUP * 8)
    if Bp != B:
        x1 = jnp.pad(x1, ((0, Bp - B), (0, 0)))
        other = jnp.pad(other, ((0, Bp - B), (0, 0)))

    R = Bp // GROUP
    xp = x1.reshape(R, PACKED_IN)        # zero-copy contiguous reshape
    other_p = other.reshape(R, LANES)    # zero-copy contiguous reshape

    tr = _pick_row_tile(R)
    grid = (pl.cdiv(R, tr),)

    out_p = pl.pallas_call(
        _linear_add_relu_kernel,
        out_shape=jax.ShapeDtypeStruct((R, LANES), x1.dtype),
        grid=grid,
        in_specs=[
            # NOTE: if DMA is still exposed on v7x, pipeline_mode=pl.Buffered(3)
            # on the two streamed inputs is a cheap sweepable knob.
            pl.BlockSpec((tr, PACKED_IN), lambda i: (i, 0)),
            pl.BlockSpec((PACKED_IN, LANES), lambda i: (0, 0)),   # resident
            pl.BlockSpec((1, LANES), lambda i: (0, 0)),           # resident
            pl.BlockSpec((tr, LANES), lambda i: (i, 0)),
        ],
        out_specs=pl.BlockSpec((tr, LANES), lambda i: (i, 0)),
        compiler_params=pltpu.CompilerParams(
            dimension_semantics=("parallel",)),
    )(xp, a_packed, bias_packed, other_p)

    out = out_p.reshape(Bp, OUT_FEATURES)   # zero-copy reshape back
    return out[:B] if Bp != B else out


if __name__ == "__main__":
    key = jax.random.PRNGKey(0)
    k_x, k_o, k_w, k_b, k_x2, k_o2 = jax.random.split(key, 6)

    # PyTorch Linear(3, 8) style init U(-1/sqrt(in), 1/sqrt(in)); packing done
    # ONCE at setup (never in the per-call hot path).
    bound = 1.0 / (IN_FEATURES ** 0.5)
    weight = jax.random.uniform(k_w, (OUT_FEATURES, IN_FEATURES), jnp.float32,
                                -bound, bound)
    bias = jax.random.uniform(k_b, (OUT_FEATURES,), jnp.float32, -bound, bound)
    a_packed, bias_packed = pack_params(weight, bias)

    def ref_fn(x1, other):
        return jnp.maximum(x1 @ weight.T + bias + other, 0.0)

    # Main check: batch divisible by 16 -> pure zero-copy fast path, 2 grid steps.
    B = 256
    x1 = jax.random.normal(k_x, (B, IN_FEATURES), dtype=jnp.float32)
    other = jax.random.normal(k_o, (B, OUT_FEATURES), dtype=jnp.float32)
    out = linear_add_relu(x1, other, a_packed, bias_packed)
    jax.block_until_ready(out)
    assert out.shape == (B, OUT_FEATURES)
    assert jnp.allclose(out, ref_fn(x1, other), atol=1e-5, rtol=1e-5), \
        "mismatch vs reference (B=256)"

    # Ragged-batch check: exercises the pad-and-slice fallback path.
    B2 = 2
    x1b = jax.random.normal(k_x2, (B2, IN_FEATURES), dtype=jnp.float32)
    otherb = jax.random.normal(k_o2, (B2, OUT_FEATURES), dtype=jnp.float32)
    outb = linear_add_relu(x1b, otherb, a_packed, bias_packed)
    jax.block_until_ready(outb)
    assert outb.shape == (B2, OUT_FEATURES)
    assert jnp.allclose(outb, ref_fn(x1b, otherb), atol=1e-5, rtol=1e-5), \
        "mismatch vs reference (B=2 padded path)"

    print("KERNEL_OK")
</pallas_src>

<mosaic_0001>
module attributes {stable_mosaic.version = 11 : i64} {
  func.func @_linear_add_relu_kernel(%arg0: i32, %arg1: memref<8x48xf32, #tpu.memory_space<vmem>>, %arg2: memref<48x128xf32, #tpu.memory_space<vmem>>, %arg3: memref<1x128xf32, #tpu.memory_space<vmem>>, %arg4: memref<8x128xf32, #tpu.memory_space<vmem>>, %arg5: memref<8x128xf32, #tpu.memory_space<vmem>>) attributes {dimension_semantics = [#tpu.dimension_semantics<parallel>], iteration_bounds = array<i64: 2>, scalar_prefetch = 0 : i64, scratch_operands = 0 : i64, tpu.core_type = #tpu.core_type<tc>, window_params = [{transform_indices = @transform_0, window_bounds = array<i64: 8, 48>}, {pipeline_mode = #tpu.pipeline_mode<synchronous>, transform_indices = @transform_1, window_bounds = array<i64: 48, 128>}, {pipeline_mode = #tpu.pipeline_mode<synchronous>, transform_indices = @transform_2, window_bounds = array<i64: 1, 128>}, {transform_indices = @transform_3, window_bounds = array<i64: 8, 128>}, {transform_indices = @transform_4, window_bounds = array<i64: 8, 128>}]} {
    %c0 = arith.constant 0 : index
    %c0_0 = arith.constant 0 : index
    %0 = vector.load %arg1[%c0, %c0_0] : memref<8x48xf32, #tpu.memory_space<vmem>>, vector<8x48xf32>
    %c0_1 = arith.constant 0 : index
    %c0_2 = arith.constant 0 : index
    %1 = vector.load %arg2[%c0_1, %c0_2] : memref<48x128xf32, #tpu.memory_space<vmem>>, vector<48x128xf32>
    %cst = arith.constant dense<0.000000e+00> : vector<8x128xf32>
    %2 = tpu.matmul %0, %1, %cst {dimension_numbers = #tpu.dot_dimension_numbers<[1], [0], [0], [1], [0, 0, 1, 1], [], []>} : vector<8x48xf32>, vector<48x128xf32>, vector<8x128xf32> -> vector<8x128xf32>
    %c0_3 = arith.constant 0 : index
    %c0_4 = arith.constant 0 : index
    %3 = vector.load %arg3[%c0_3, %c0_4] : memref<1x128xf32, #tpu.memory_space<vmem>>, vector<1x128xf32>
    %4 = vector.broadcast %3 : vector<1x128xf32> to vector<8x128xf32>
    %5 = arith.addf %2, %4 : vector<8x128xf32>
    %c0_5 = arith.constant 0 : index
    %c0_6 = arith.constant 0 : index
    %6 = vector.load %arg4[%c0_5, %c0_6] : memref<8x128xf32, #tpu.memory_space<vmem>>, vector<8x128xf32>
    %7 = arith.addf %5, %6 : vector<8x128xf32>
    %cst_7 = arith.constant 0.000000e+00 : f32
    %8 = vector.broadcast %cst_7 : f32 to vector<8x128xf32>
    %9 = arith.maximumf %7, %8 : vector<8x128xf32>
    %c0_8 = arith.constant 0 : index
    %c0_9 = arith.constant 0 : index
    %10 = vector.load %arg5[%c0_8, %c0_9] : memref<8x128xf32, #tpu.memory_space<vmem>>, vector<8x128xf32>
    tpu.vector_store %arg5[%c0_8, %c0_9], %9 {strides = array<i32>} : memref<8x128xf32, #tpu.memory_space<vmem>>, vector<8x128xf32>,
    return
  }
  func.func @transform_0(%arg0: i32) -> (i32, i32) {
    %c0_i32 = arith.constant 0 : i32
    %c0_i32_0 = arith.constant 0 : i32
    return %arg0, %c0_i32 : i32, i32
  }
  func.func @transform_1(%arg0: i32) -> (i32, i32) {
    %c0_i32 = arith.constant 0 : i32
    %c0_i32_0 = arith.constant 0 : i32
    %c0_i32_1 = arith.constant 0 : i32
    return %c0_i32, %c0_i32_0 : i32, i32
  }
  func.func @transform_2(%arg0: i32) -> (i32, i32) {
    %c0_i32 = arith.constant 0 : i32
    %c0_i32_0 = arith.constant 0 : i32
    %c0_i32_1 = arith.constant 0 : i32
    return %c0_i32, %c0_i32_0 : i32, i32
  }
  func.func @transform_3(%arg0: i32) -> (i32, i32) {
    %c0_i32 = arith.constant 0 : i32
    %c0_i32_0 = arith.constant 0 : i32
    return %arg0, %c0_i32 : i32, i32
  }
  func.func @transform_4(%arg0: i32) -> (i32, i32) {
    %c0_i32 = arith.constant 0 : i32
    %c0_i32_0 = arith.constant 0 : i32
    return %arg0, %c0_i32 : i32, i32
  }
}

</mosaic_0001>

<bundles_post_ra>
// kernel: linear_add_relu.1
= control target key start
LH: loop header
LB: loop body
LE: loop exit
PB: predicated region body
PF: predicated region fallthrough
CT: control target
= control target key end

     0   :  { %s457_s15 = smov 0   ;;  %s498_s0 = inlined_call_operand.vmem [shape: f32[16,48], index: 0, kind: input, shape index: {}]   ;;  %s499_s1 = inlined_call_operand.vmem [shape: f32[48,128], index: 1, kind: input, shape index: {}]   ;;  %s500_s2 = inlined_call_operand.vmem [shape: f32[1,128], index: 2, kind: input, shape index: {}]   ;;  %s501_s3 = inlined_call_operand.vmem [shape: f32[16,128], index: 3, kind: input, shape index: {}]   ;;  %s502_s4 = inlined_call_operand.vmem [shape: f32[16,128], index: 4, kind: output, shape index: {}]  }
   0x1 LB: > { %s367_s16 = sadd.s32 4294967295, %s427_s15   ;;  %p371_p0 = scmp.ge.s32.totalorder %s427_s15, 1  ;;  %s427_s15 = sphi %s457_s15, %s14_s15  }
   0x2   : > { %p170_p1 = scmp.lt.s32.totalorder %s427_s15, 3 }
   0x4   : > { %p171_p2 = pnand %p371_p0, %p170_p1 }
   0x5   : > { %v211_v0 = vld [vmem:[%s499_s1] sm:$0xff] (!%p171_p2)  ;;  %v212_v1 = vld [vmem:[%s499_s1 + $0x8] sm:$0xff] (!%p171_p2)  ;;  %v213_v2 = vld [vmem:[%s499_s1 + $0x10] sm:$0xff] (!%p171_p2)  ;;  %v429_v3 = vmov (!%p171_p2), 0.0|0.0   ;;  %vm430_vm0 = vmmov (!%p171_p2), 0   ;;  %v431_v6 = vmov (!%p171_p2), 0.0  }
   0x6   : > { %174 = sbr.rel (%p171_p2) target bundleno = 238 (0xee), region = 36  ;;  %401 = vmatprep.subr.bf16.mxu0 (!%p171_p2), %v429_v3  ;;  %v402_v4 = vpack.c.bf16 (!%p171_p2), %v212_v1, %v211_v0  ;;  %v214_v5 = vld [vmem:[%s499_s1 + $0x18] sm:$0xff] (!%p171_p2)  ;;  %398 = vmatprep.mubr.msk.f32.mxu0 (!%p171_p2), %vm430_vm0, %v431_v6  ;;  %p198_p3 = scmp.lt.s32.totalorder (!%p171_p2), %s367_s16, 1  ;;  %v215_v8 = vld [vmem:[%s499_s1 + $0x20] sm:$0xff] (!%p171_p2)  ;;  %v216_v9 = vld [vmem:[%s499_s1 + $0x28] sm:$0xff] (!%p171_p2)  ;;  %vm224_vm1 = vcmask (!%p171_p2), 392192  }
   0x7   : > { %v405_v7 = vpack.c.bf16 (!%p171_p2), %v214_v5, %v213_v2  ;;  %v408_v10 = vpack.c.bf16 (!%p171_p2), %v216_v9, %v215_v8  ;;  %v375_v12 = vld [vmem:[%s500_s2] ss:$0 sm:$0xff] (!%p171_p2) }
   0x8   : > { %403 = vmatpush3.bf16.msra.mxu0 (!%p171_p2), %v402_v4 }
   0x9   : > { %404 = vmatprep.subr.bf16.mxu0 (!%p171_p2), %v429_v3 }
   0xc   : > { %406 = vmatpush3.bf16.msra.mxu0 (!%p171_p2), %v405_v7 }
   0xd   : > { %s504_s16 = smov (!%p198_p3, %s367_s16), 1  ;;  %407 = vmatprep.subr.bf16.mxu0 %v429_v3 }
   0xe   : > { %s372_s29 = sshll.u32 %s504_s16, 3 }
   0xf   : > { %s201_s6 = scalar_lea.vmem %s498_s0, %s372_s29  ;;  %s205_s9 = scalar_lea.vmem %s501_s3, %s372_s29 }
  0x10   : > { %409 = vmatpush3.bf16.msra.mxu0 %v408_v10  ;;  %v210_v11 = vld [vmem:[%s201_s6] sm:$0xff]  ;;  %s209_s14 = scalar_lea.vmem %s502_s4, %s372_s29 }
  0x11   : > { %v298_v14 = vld [vmem:[%s205_s9] sm:$0xff] }
  0x13   : > { %399 = vmatmul.mubr.msk.f32.vlgmr.msra.gmra.mrb[0].mxu0 %vm224_vm1, %v210_v11 }
  0xe6   : > { %v294_v13 = vpop.f32.mrb[0].mxu0 }
  0xe7   : > { %v295_v15 = vadd.f32 %v375_v12, %v294_v13  ;;  %v400_v16 = vpop.f32.mrb[1].mxu0 }
  0xe9   : > { %v299_v17 = vadd.f32 %v298_v14, %v295_v15 }
  0xeb   : > { %v300_v18 = vmax.f32 %v299_v17, 0.0 }
  0xed   : > { %301 = vst [vmem:[%s209_s14] sm:$0xff] %v300_v18 }
  0xee PF: > { %s14_s15 = sadd.s32 1, %s427_s15  }
  0xef   : > { %p11_p4 = scmp.ge.s32.totalorder %s14_s15, 4  }
  0xf1   :  { %13 = sbr.rel (!%p11_p4) target bundleno = 1 (0x1), region = 69 }

</bundles_post_ra>
